<compile_context>
chip_gen: v7x
topology: tpu7x:2x2x1
jax: 0.10.0
libtpu: 0.0.40
codegen_flags: <defaults>
</compile_context>

<pallas_src>
import functools

import jax
import jax.numpy as jnp
from jax.experimental import pallas as pl
from jax.experimental.pallas import tpu as pltpu


def _round_up(x, m):
    return ((x + m - 1) // m) * m


def pg_forward_kernel(x_ref, w1_ref, b1_ref, w2_ref, b2_ref, out_ref):
    # fc1: [TB, I] @ [I, H] -> f32, + [1, H]   (f32 MXU; kernel is DMA-bound)
    x = x_ref[...].astype(jnp.float32)
    h = jnp.dot(x, w1_ref[...], preferred_element_type=jnp.float32) + b1_ref[...]
    # ReLU
    h = jnp.maximum(h, 0.0)
    # fc2: [TB, H] @ [H, O] -> f32, + [1, O]
    logits = jnp.dot(h, w2_ref[...], preferred_element_type=jnp.float32) + b2_ref[...]
    # numerically stable softmax over the feature axis (dim=1)
    m = jnp.max(logits, axis=-1, keepdims=True)
    e = jnp.exp(logits - m)
    denom = jnp.sum(e, axis=-1, keepdims=True)
    out_ref[...] = (e / denom).astype(out_ref.dtype)


@functools.partial(jax.jit, static_argnames=("input_size", "block_b"))
def pg_network_forward(x, w1, b1, w2, b2, *, input_size, block_b=4096):
    # glue: mimic inputs.view(-1, self.input_size); no dtype cast, no padding.
    x = x.reshape(-1, input_size)
    batch = x.shape[0]
    hidden = w1.shape[1]
    out_dim = w2.shape[1]

    # batch tiling: TB rows per grid step; ragged last tile handled by Pallas.
    if batch <= block_b:
        tb = batch                                  # single tile == full dim (legal)
    else:
        tb = _round_up(min(block_b, batch), 8)      # f32 sublane-friendly tile rows
    num_tiles = pl.cdiv(batch, tb)

    b1_f = b1.reshape(1, hidden).astype(jnp.float32)
    b2_f = b2.reshape(1, out_dim).astype(jnp.float32)

    out = pl.pallas_call(
        pg_forward_kernel,
        out_shape=jax.ShapeDtypeStruct((batch, out_dim), jnp.float32),
        grid=(num_tiles,),
        in_specs=[
            pl.BlockSpec((tb, input_size), lambda i: (i, 0)),      # x tile
            pl.BlockSpec((input_size, hidden), lambda i: (0, 0)),  # w1 (resident)
            pl.BlockSpec((1, hidden), lambda i: (0, 0)),           # b1 (resident)
            pl.BlockSpec((hidden, out_dim), lambda i: (0, 0)),     # w2 (resident)
            pl.BlockSpec((1, out_dim), lambda i: (0, 0)),          # b2 (resident)
        ],
        out_specs=pl.BlockSpec((tb, out_dim), lambda i: (i, 0)),
        compiler_params=pltpu.CompilerParams(
            dimension_semantics=("parallel",)),
    )(x, w1, b1_f, w2, b2_f)

    return out


def init_params(key, input_size, hidden_size, output_size):
    # Deterministic synthetic init (PyTorch-Linear-like uniform fan-in scaling).
    k1, k2, k3, k4 = jax.random.split(key, 4)
    bound1 = 1.0 / jnp.sqrt(jnp.float32(input_size))
    bound2 = 1.0 / jnp.sqrt(jnp.float32(hidden_size))
    # stored as [in, out] (transpose of nn.Linear's [out, in])
    w1 = jax.random.uniform(k1, (input_size, hidden_size), jnp.float32, -bound1, bound1)
    b1 = jax.random.uniform(k2, (1, hidden_size), jnp.float32, -bound1, bound1)
    w2 = jax.random.uniform(k3, (hidden_size, output_size), jnp.float32, -bound2, bound2)
    b2 = jax.random.uniform(k4, (1, output_size), jnp.float32, -bound2, bound2)
    return w1, b1, w2, b2


def reference_forward(x, w1, b1, w2, b2, input_size):
    x = x.reshape(-1, input_size).astype(jnp.float32)
    h = jnp.maximum(
        jnp.dot(x, w1, precision=jax.lax.Precision.HIGHEST) + b1, 0.0)
    logits = jnp.dot(h, w2, precision=jax.lax.Precision.HIGHEST) + b2
    return jax.nn.softmax(logits, axis=1)


if __name__ == "__main__":
    input_size = 16
    hidden_size = 32
    output_size = 8

    key = jax.random.PRNGKey(0)
    kx1, kx2, kp = jax.random.split(key, 3)
    w1, b1, w2, b2 = init_params(kp, input_size, hidden_size, output_size)

    # --- test 1: small multi-dim input, exercises view(-1, input_size) ---
    x = jax.random.normal(kx1, (2, 2, input_size), jnp.float32)   # -> batch 4
    out = pg_network_forward(x, w1, b1, w2, b2, input_size=input_size)
    out = jax.block_until_ready(out)
    ref = reference_forward(x, w1, b1, w2, b2, input_size)
    assert out.shape == (4, output_size)
    assert jnp.allclose(out, ref, atol=2e-3, rtol=2e-3)
    assert jnp.allclose(jnp.sum(out, axis=1), jnp.ones((4,)), atol=1e-4)

    # --- test 2: multi-tile grid with a ragged last tile (exercises pipeline) ---
    batch2 = 300
    x2 = jax.random.normal(kx2, (batch2, input_size), jnp.float32)
    out2 = pg_network_forward(x2, w1, b1, w2, b2, input_size=input_size, block_b=64)
    out2 = jax.block_until_ready(out2)
    ref2 = reference_forward(x2, w1, b1, w2, b2, input_size)
    assert out2.shape == (batch2, output_size)
    assert jnp.allclose(out2, ref2, atol=2e-3, rtol=2e-3)
    assert jnp.allclose(jnp.sum(out2, axis=1), jnp.ones((batch2,)), atol=1e-4)

    print("KERNEL_OK")
</pallas_src>

<mosaic_0001>
module attributes {stable_mosaic.version = 11 : i64} {
  func.func @pg_forward_kernel(%arg0: i32, %arg1: memref<4x16xf32, #tpu.memory_space<vmem>>, %arg2: memref<16x32xf32, #tpu.memory_space<vmem>>, %arg3: memref<1x32xf32, #tpu.memory_space<vmem>>, %arg4: memref<32x8xf32, #tpu.memory_space<vmem>>, %arg5: memref<1x8xf32, #tpu.memory_space<vmem>>, %arg6: memref<4x8xf32, #tpu.memory_space<vmem>>) attributes {dimension_semantics = [#tpu.dimension_semantics<parallel>], iteration_bounds = array<i64: 1>, scalar_prefetch = 0 : i64, scratch_operands = 0 : i64, tpu.core_type = #tpu.core_type<tc>, window_params = [{transform_indices = @transform_0, window_bounds = array<i64: 4, 16>}, {pipeline_mode = #tpu.pipeline_mode<synchronous>, transform_indices = @transform_1, window_bounds = array<i64: 16, 32>}, {pipeline_mode = #tpu.pipeline_mode<synchronous>, transform_indices = @transform_2, window_bounds = array<i64: 1, 32>}, {pipeline_mode = #tpu.pipeline_mode<synchronous>, transform_indices = @transform_3, window_bounds = array<i64: 32, 8>}, {pipeline_mode = #tpu.pipeline_mode<synchronous>, transform_indices = @transform_4, window_bounds = array<i64: 1, 8>}, {transform_indices = @transform_5, window_bounds = array<i64: 4, 8>}]} {
    %c0 = arith.constant 0 : index
    %c0_0 = arith.constant 0 : index
    %0 = vector.load %arg1[%c0, %c0_0] : memref<4x16xf32, #tpu.memory_space<vmem>>, vector<4x16xf32>
    %c0_1 = arith.constant 0 : index
    %c0_2 = arith.constant 0 : index
    %1 = vector.load %arg2[%c0_1, %c0_2] : memref<16x32xf32, #tpu.memory_space<vmem>>, vector<16x32xf32>
    %cst = arith.constant dense<0.000000e+00> : vector<4x32xf32>
    %2 = tpu.matmul %0, %1, %cst {dimension_numbers = #tpu.dot_dimension_numbers<[1], [0], [0], [1], [0, 0, 1, 1], [], []>} : vector<4x16xf32>, vector<16x32xf32>, vector<4x32xf32> -> vector<4x32xf32>
    %c0_3 = arith.constant 0 : index
    %c0_4 = arith.constant 0 : index
    %3 = vector.load %arg3[%c0_3, %c0_4] : memref<1x32xf32, #tpu.memory_space<vmem>>, vector<1x32xf32>
    %4 = vector.broadcast %3 : vector<1x32xf32> to vector<4x32xf32>
    %5 = arith.addf %2, %4 : vector<4x32xf32>
    %cst_5 = arith.constant 0.000000e+00 : f32
    %6 = vector.broadcast %cst_5 : f32 to vector<4x32xf32>
    %7 = arith.maximumf %5, %6 : vector<4x32xf32>
    %c0_6 = arith.constant 0 : index
    %c0_7 = arith.constant 0 : index
    %8 = vector.load %arg4[%c0_6, %c0_7] : memref<32x8xf32, #tpu.memory_space<vmem>>, vector<32x8xf32>
    %cst_8 = arith.constant dense<0.000000e+00> : vector<4x8xf32>
    %9 = tpu.matmul %7, %8, %cst_8 {dimension_numbers = #tpu.dot_dimension_numbers<[1], [0], [0], [1], [0, 0, 1, 1], [], []>} : vector<4x32xf32>, vector<32x8xf32>, vector<4x8xf32> -> vector<4x8xf32>
    %c0_9 = arith.constant 0 : index
    %c0_10 = arith.constant 0 : index
    %10 = vector.load %arg5[%c0_9, %c0_10] : memref<1x8xf32, #tpu.memory_space<vmem>>, vector<1x8xf32>
    %11 = vector.broadcast %10 : vector<1x8xf32> to vector<4x8xf32>
    %12 = arith.addf %9, %11 : vector<4x8xf32>
    %cst_11 = arith.constant dense<0xFF800000> : vector<4xf32>
    %13 = vector.multi_reduction <maximumf>, %12, %cst_11 [1] : vector<4x8xf32> to vector<4xf32>
    %14 = vector.shape_cast %13 : vector<4xf32> to vector<4x1xf32>
    %15 = vector.broadcast %14 : vector<4x1xf32> to vector<4x8xf32>
    %16 = arith.subf %12, %15 : vector<4x8xf32>
    %17 = math.exp %16 : vector<4x8xf32>
    %cst_12 = arith.constant dense<0.000000e+00> : vector<4xf32>
    %18 = vector.multi_reduction <add>, %17, %cst_12 [1] : vector<4x8xf32> to vector<4xf32>
    %19 = vector.shape_cast %18 : vector<4xf32> to vector<4x1xf32>
    %20 = vector.broadcast %19 : vector<4x1xf32> to vector<4x8xf32>
    %21 = arith.divf %17, %20 : vector<4x8xf32>
    %c0_13 = arith.constant 0 : index
    %c0_14 = arith.constant 0 : index
    %22 = vector.load %arg6[%c0_13, %c0_14] : memref<4x8xf32, #tpu.memory_space<vmem>>, vector<4x8xf32>
    tpu.vector_store %arg6[%c0_13, %c0_14], %21 {strides = array<i32>} : memref<4x8xf32, #tpu.memory_space<vmem>>, vector<4x8xf32>,
    return
  }
  func.func @transform_0(%arg0: i32) -> (i32, i32) {
    %c0_i32 = arith.constant 0 : i32
    %c0_i32_0 = arith.constant 0 : i32
    return %arg0, %c0_i32 : i32, i32
  }
  func.func @transform_1(%arg0: i32) -> (i32, i32) {
    %c0_i32 = arith.constant 0 : i32
    %c0_i32_0 = arith.constant 0 : i32
    %c0_i32_1 = arith.constant 0 : i32
    return %c0_i32, %c0_i32_0 : i32, i32
  }
  func.func @transform_2(%arg0: i32) -> (i32, i32) {
    %c0_i32 = arith.constant 0 : i32
    %c0_i32_0 = arith.constant 0 : i32
    %c0_i32_1 = arith.constant 0 : i32
    return %c0_i32, %c0_i32_0 : i32, i32
  }
  func.func @transform_3(%arg0: i32) -> (i32, i32) {
    %c0_i32 = arith.constant 0 : i32
    %c0_i32_0 = arith.constant 0 : i32
    %c0_i32_1 = arith.constant 0 : i32
    return %c0_i32, %c0_i32_0 : i32, i32
  }
  func.func @transform_4(%arg0: i32) -> (i32, i32) {
    %c0_i32 = arith.constant 0 : i32
    %c0_i32_0 = arith.constant 0 : i32
    %c0_i32_1 = arith.constant 0 : i32
    return %c0_i32, %c0_i32_0 : i32, i32
  }
  func.func @transform_5(%arg0: i32) -> (i32, i32) {
    %c0_i32 = arith.constant 0 : i32
    %c0_i32_0 = arith.constant 0 : i32
    return %arg0, %c0_i32 : i32, i32
  }
}

</mosaic_0001>

<bundles_post_ra>
// kernel: pg_network_forward.1
= control target key start
LH: loop header
LB: loop body
LE: loop exit
PB: predicated region body
PF: predicated region fallthrough
CT: control target
= control target key end

     0   :  { %v289_v2 = vmov 0.0|0.0   ;;  %vm290_vm0 = vmmov 0   ;;  %v291_v4 = vmov 0.0   ;;  %s365_s0 = inlined_call_operand.vmem [shape: f32[4,16], index: 0, kind: input, shape index: {}]   ;;  %s366_s1 = inlined_call_operand.vmem [shape: f32[16,32], index: 1, kind: input, shape index: {}]   ;;  %s367_s2 = inlined_call_operand.vmem [shape: f32[1,32], index: 2, kind: input, shape index: {}]   ;;  %s368_s3 = inlined_call_operand.vmem [shape: f32[32,8], index: 3, kind: input, shape index: {}]   ;;  %s369_s4 = inlined_call_operand.vmem [shape: f32[1,8], index: 4, kind: input, shape index: {}]   ;;  %s370_s5 = inlined_call_operand.hbm [shape: f32[4,8], index: 5, kind: output, shape index: {}]  }
   0x1   :  { %v22_v0 = vld [vmem:[%s366_s1] sm:$0xff]  ;;  %v23_v1 = vld [vmem:[%s366_s1 + $0x8] sm:$0xff]  ;;  %248 = vmatprep.subr.bf16.mxu0 %v289_v2  ;;  %234 = vmatprep.mubr.msk.f32.mxu0 %vm290_vm0, %v291_v4 }
   0x2   :  { %v249_v3 = vpack.c.bf16 %v23_v1, %v22_v0  ;;  %v106_v5 = vld [vmem:[%s368_s3] sm:$0xff]  ;;  %v107_v6 = vld [vmem:[%s368_s3 + $0x8] sm:$0xff]  ;;  %251 = vmatprep.subr.bf16.mxu1 %v289_v2  ;;  %245 = vmatprep.mubr.msk.f32.mxu1 %vm290_vm0, %v291_v4 }
   0x3   :  { %v252_v7 = vpack.c.bf16 %v107_v6, %v106_v5 }
   0x4   :  { %10 = vsyncpa [#allocation3], 0  ;;  %250 = vmatpush3.bf16.msra.mxu0 %v249_v3  ;;  %v21_v8 = vld [vmem:[%s365_s0] sm:$0xf]  ;;  %vm31_vm1 = vcmask 130048   ;;  %v108_v9 = vld [vmem:[%s368_s3 + $0x10] sm:$0xff] }
   0x5   :  { %253 = vmatpush3.bf16.msra.mxu1 %v252_v7  ;;  %v109_v10 = vld [vmem:[%s368_s3 + $0x18] sm:$0xff]  ;;  %v218_v12 = vld [vmem:[%s367_s2] ss:$0 sm:$0xff]  ;;  %vm117_vm2 = vcmask 261120   ;;  %vm191_vm3 = vcmask 60416   ;;  %s292_s2 = smov [#allocation2]  }
   0x6   :  { %254 = vmatprep.subr.bf16.mxu1 %v289_v2  ;;  %v255_v11 = vpack.c.bf16 %v109_v10, %v108_v9  ;;  %v220_v17 = vld [vmem:[%s369_s4] ss:$0 sm:$0xff]  ;;  %s210_s3 = sshll.u32 %s292_s2, 4  ;;  %s211_s3 = int_to_ptr.vmem [resolvable:$true] %s210_s3 }
   0x7   :  { %235 = vmatmul.mubr.msk.f32.vlgmr.msra.gmra.mrb[0].mxu0 %vm31_vm1, %v21_v8  ;;  %s265_s4 = scalar_lea.vmem %s211_s3, 64  ;;  %p270_p1 = scmp.lt.s32.totalorder %s211_s3, %s211_s3 }
   0x8   :  { %p266_p0 = scmp.ne.s32.totalorder %s211_s3, %s265_s4  ;;  %p271_p2 = scmp.lt.s32.totalorder %s265_s4, %s265_s4 }
   0x9   :  { %256 = vmatpush3.bf16.msra.mxu1 %v255_v11 }
   0xa   :  { %p272_p3 = por %p271_p2, %p270_p1 }
   0xc   :  { %p273_p4 = pnand %p272_p3, %p266_p0 }
  0xda   :  { %v101_v13 = vpop.f32.mrb[0].mxu0 }
  0xdb   :  { %v102_v14 = vadd.f32 %v218_v12, %v101_v13  ;;  %v236_v15 = vpop.f32.mrb[1].mxu0 }
  0xdd   :  { %v105_v16 = vmax.f32 %v102_v14, 0.0 }
  0xdf   :  { %246 = vmatmul.mubr.msk.f32.vlgmr.msra.gmra.mrb[0].mxu1 %vm117_vm2, %v105_v16 }
 0x1b2   :  { %v187_v18 = vpop.f32.mrb[0].mxu1 }
 0x1b3   :  { %v188_v19 = vadd.f32 %v220_v17, %v187_v18  ;;  %v247_v20 = vpop.f32.mrb[1].mxu1 }
 0x1b5   :  { %v192_v21 = vsel %vm191_vm3, %v188_v19, -inf }
 0x1b6   :  { %193 = vmax.xlane.f32.xlu0 %v192_v21 }
 0x243   :  { %v194_v22 = vpop.xlane.xlu0 %193 }
 0x244   :  { %v195_v23 = vsub.f32 %v188_v19, %v194_v22 }
 0x246   :  { %v196_v24 = vmul.f32 1.442695, %v195_v23 }
 0x248   :  { %261 = vpow2.f32 %v196_v24 }
 0x252   :  { %v262_v25 = vpop.eup %261 }
 0x253   :  { %v198_v26 = vsel %vm191_vm3, %v262_v25, 0.0 }
 0x254   :  { %199 = vadd.xlane.f32.xlu0 %v198_v26 }
 0x2e1   :  { %v200_v27 = vpop.xlane.xlu0 %199 }
 0x2e2   :  { %263 = vrcp.f32 %v200_v27 }
 0x2ec   :  { %v264_v28 = vpop.eup %263 }
 0x2ed   :  { %v202_v29 = vmul.f32 %v264_v28, %v262_v25 }
 0x2ef   :  { %203 = vst.msk [vmem:[#allocation2] sm:$0xf] %vm191_vm3, %v202_v29 }
 0x2f0   :  { %276 = shalt.err (!%p273_p4)
}
 0x2f1   :  { %s277_s11 = scalar_lea.hbm %s370_s5, 64 }
 0x2f2   :  { %p278_p5 = scmp.ne.s32.totalorder %s370_s5, %s277_s11  ;;  %p281_p6 = scmp.lt.u32.totalorder %s277_s11, %s370_s5 }
 0x2f4   :  { %p283_p7 = pnand %p281_p6, %p278_p5 }
 0x2f6   :  { %286 = shalt.err (!%p283_p7)
}
 0x2f7   :  { %213 = dma.vmem_to_hbm [thread:$0]  %s211_s3, 64, %s370_s5, [#allocation3]  }
 0x2f8   :  { %287 = dma.done.wait [#allocation3], 64  }
 0x2f9   :  { %288 = vsyncadd [#allocation3], 4294967232 }
 0x2fa   :  { %217 = vsyncpa [#allocation3], 1 }

</bundles_post_ra>
